<compile_context>
chip_gen: v6e
topology: v6e:2x2x1
jax: 0.10.0
libtpu: 0.0.40
codegen_flags: <defaults>
</compile_context>

<pallas_src>
import jax
import jax.numpy as jnp
from jax.experimental import pallas as pl
from jax.experimental.pallas import tpu as pltpu


def _round_up(x, m):
    return ((x + m - 1) // m) * m


# ----------------------------- kernels ---------------------------------------


def _proj_kernel_fused(x_ref, w_ref, b_ref, o_ref):
    # Full contraction in one grid step: no accumulator scratch, no init/finalize.
    acc = jnp.dot(x_ref[...], w_ref[...], preferred_element_type=jnp.float32)
    o_ref[...] = (acc + b_ref[...].astype(jnp.float32)).astype(o_ref.dtype)


def _proj_kernel_ktiled(x_ref, w_ref, b_ref, o_ref, acc_ref):
    # Fallback for very large d_model: tile the contraction axis (last grid axis).
    k = pl.program_id(2)

    @pl.when(k == 0)
    def _():
        # Seed the accumulator with the bias so the finalize step is a pure cast.
        acc_ref[...] = jnp.broadcast_to(
            b_ref[...].astype(jnp.float32), acc_ref.shape)

    acc_ref[...] += jnp.dot(x_ref[...], w_ref[...],
                            preferred_element_type=jnp.float32)

    @pl.when(k == pl.num_programs(2) - 1)
    def _():
        o_ref[...] = acc_ref[...].astype(o_ref.dtype)


# --------------------------- parameter prep ----------------------------------


def prepare_projection_params(w_torch, b, *, compute_dtype=jnp.bfloat16, tn=None):
    """One-time weight preparation (hoisted out of the per-call path).

    w_torch: (tgt_vocab_size, d_model)  -- the layout nn.Linear stores.
    b:       (tgt_vocab_size,)
    Returns dict with the MXU-layout padded/cast weight (D_pad, V_pad), the f32
    bias (1, V_pad), the chosen vocab tile, and the original dims.
    """
    V, D = w_torch.shape
    if tn is None:
        tn = 2048 if jnp.dtype(compute_dtype).itemsize == 2 else 1024

    D_pad = _round_up(D, 128)   # lane dim of x tiles / sublane dim of w tiles
    V_pad = _round_up(V, 128)   # lane dim of w and output tiles

    # Pick a vocab tile that divides V_pad (output slice stays a no-op for the
    # common case of V a multiple of 128); if only a tiny divisor exists, over-pad.
    t = (min(tn, V_pad) // 128) * 128
    while t > 128 and V_pad % t != 0:
        t -= 128
    if t < min(512, V_pad):
        t = tn
        V_pad = _round_up(V_pad, t)
    tn = t

    w_p = jnp.pad(w_torch.T.astype(compute_dtype),
                  ((0, D_pad - D), (0, V_pad - V)))
    b_p = jnp.pad(b.astype(jnp.float32), (0, V_pad - V)).reshape(1, V_pad)
    return {"w": w_p, "b": b_p, "tn": int(tn), "d_model": int(D), "vocab": int(V)}


# ------------------------------ wrapper ---------------------------------------


def projection(x, params, *, tm=None, out_dtype=None, tk_max=4096,
               vmem_budget_bytes=44 << 20):
    """x: [B, S, d_model] -> [B, S, tgt_vocab_size], using prepared params."""
    w_p, b_p = params["w"], params["b"]
    D, V, tn = params["d_model"], params["vocab"], params["tn"]

    B, S, Dx = x.shape
    assert Dx == D, f"expected d_model={D}, got {Dx}"
    D_pad, V_pad = w_p.shape
    compute_dtype = w_p.dtype
    out_dtype = out_dtype or x.dtype

    in_b = jnp.dtype(compute_dtype).itemsize
    out_b = jnp.dtype(out_dtype).itemsize
    sub = 16 if in_b == 2 else 8

    N = B * S
    if tm is None:
        tm = 1024 if in_b == 2 else 512
    tm = min(tm, _round_up(N, sub))

    def footprint(tm_, tn_, tk_, with_acc):
        buf = 2 * (tm_ * tk_ * in_b + tk_ * tn_ * in_b + tm_ * tn_ * out_b)
        buf += 2 * tn_ * 4                       # bias tile (double-buffered)
        if with_acc:
            buf += tm_ * tn_ * 4                 # f32 accumulator scratch
        return buf

    # Prefer collapsing the contraction axis (no k grid axis, no accumulator RMW).
    fused = D_pad <= tk_max
    if fused:
        tk = D_pad
        while footprint(tm, tn, tk, False) > vmem_budget_bytes and tn > 512 and tn % 256 == 0:
            tn //= 2
        while footprint(tm, tn, tk, False) > vmem_budget_bytes and tm > 256:
            tm = _round_up(tm // 2, sub)
        if footprint(tm, tn, tk, False) > vmem_budget_bytes:
            fused = False
    if not fused:
        tk = min(2048, D_pad)
        while D_pad % tk != 0:
            tk -= 128
        while footprint(tm, tn, tk, True) > vmem_budget_bytes and tn > 512 and tn % 256 == 0:
            tn //= 2
        while footprint(tm, tn, tk, True) > vmem_budget_bytes and tm > 256:
            tm = _round_up(tm // 2, sub)

    N_pad = _round_up(N, tm)

    # v7x has 2 TensorCores: make sure at least one parallel axis has >= 2 blocks.
    if N_pad // tm == 1 and V_pad // tn == 1 and tn % 256 == 0:
        tn //= 2

    need = footprint(tm, tn, tk, not fused)
    vmem_limit = int(min(max(need + (4 << 20), 32 << 20), 64 << 20))

    x2 = x.reshape(N, D).astype(compute_dtype)
    if N_pad != N or D_pad != D:
        x2 = jnp.pad(x2, ((0, N_pad - N), (0, D_pad - D)))

    if fused:
        grid = (N_pad // tm, V_pad // tn)
        out = pl.pallas_call(
            _proj_kernel_fused,
            out_shape=jax.ShapeDtypeStruct((N_pad, V_pad), out_dtype),
            grid_spec=pltpu.PrefetchScalarGridSpec(
                num_scalar_prefetch=0,
                grid=grid,
                in_specs=[
                    pl.BlockSpec((tm, D_pad), lambda i, j: (i, 0)),   # x rows
                    pl.BlockSpec((D_pad, tn), lambda i, j: (0, j)),   # weight cols
                    pl.BlockSpec((1, tn), lambda i, j: (0, j)),       # bias
                ],
                out_specs=pl.BlockSpec((tm, tn), lambda i, j: (i, j)),
            ),
            compiler_params=pltpu.CompilerParams(
                dimension_semantics=("parallel", "parallel"),
                vmem_limit_bytes=vmem_limit),
        )(x2, w_p, b_p)
    else:
        grid = (N_pad // tm, V_pad // tn, D_pad // tk)
        out = pl.pallas_call(
            _proj_kernel_ktiled,
            out_shape=jax.ShapeDtypeStruct((N_pad, V_pad), out_dtype),
            grid_spec=pltpu.PrefetchScalarGridSpec(
                num_scalar_prefetch=0,
                grid=grid,
                in_specs=[
                    pl.BlockSpec((tm, tk), lambda i, j, k: (i, k)),
                    pl.BlockSpec((tk, tn), lambda i, j, k: (k, j)),
                    pl.BlockSpec((1, tn), lambda i, j, k: (0, j)),
                ],
                out_specs=pl.BlockSpec((tm, tn), lambda i, j, k: (i, j)),
                scratch_shapes=[pltpu.VMEM((tm, tn), jnp.float32)],
            ),
            compiler_params=pltpu.CompilerParams(
                dimension_semantics=("parallel", "parallel", "arbitrary"),
                vmem_limit_bytes=vmem_limit),
        )(x2, w_p, b_p)

    if N_pad != N or V_pad != V:
        out = out[:N, :V]
    return out.reshape(B, S, V)


# ------------------------------- demo -----------------------------------------


if __name__ == "__main__":
    # Small shapes consistent with the module: batch=2, seq=8, d_model=32, vocab=64.
    B, S, D, V = 2, 8, 32, 64
    key = jax.random.PRNGKey(0)
    kx, kw, kb = jax.random.split(key, 3)

    x = jax.random.normal(kx, (B, S, D), dtype=jnp.float32)

    # nn.Linear(d_model, tgt_vocab_size): weight stored as (V, D), xavier_uniform_.
    xavier_bound = (6.0 / (D + V)) ** 0.5
    w_torch = jax.random.uniform(
        kw, (V, D), minval=-xavier_bound, maxval=xavier_bound, dtype=jnp.float32)
    b_bound = 1.0 / (D ** 0.5)
    b = jax.random.uniform(kb, (V,), minval=-b_bound, maxval=b_bound, dtype=jnp.float32)

    ref = jnp.dot(x, w_torch.T, precision=jax.lax.Precision.HIGHEST) + b

    # Primary (fast) path: bf16 MXU operands, f32 accumulate + bias, f32 logits out.
    params_bf16 = prepare_projection_params(w_torch, b, compute_dtype=jnp.bfloat16)
    out = jax.block_until_ready(projection(x, params_bf16))
    assert out.shape == (B, S, V)
    assert out.dtype == x.dtype
    assert jnp.allclose(out, ref, atol=3e-2, rtol=3e-2), "bf16 path mismatch vs reference"

    # f32 path (tight tolerance), fused (no k axis) variant.
    params_f32 = prepare_projection_params(w_torch, b, compute_dtype=jnp.float32)
    out32 = jax.block_until_ready(projection(x, params_f32))
    assert jnp.allclose(out32, ref, atol=1e-4, rtol=1e-4), "f32 fused path mismatch"

    # Exercise the k-tiled fallback kernel too (forced via tk_max=0).
    out32k = jax.block_until_ready(projection(x, params_f32, tk_max=0))
    assert jnp.allclose(out32k, ref, atol=1e-4, rtol=1e-4), "f32 k-tiled path mismatch"

    print("KERNEL_OK")
</pallas_src>

<mosaic_0001>
module attributes {stable_mosaic.version = 11 : i64} {
  func.func @_proj_kernel_fused(%arg0: i32, %arg1: i32, %arg2: memref<16x128xbf16, #tpu.memory_space<vmem>>, %arg3: memref<128x128xbf16, #tpu.memory_space<vmem>>, %arg4: memref<1x128xf32, #tpu.memory_space<vmem>>, %arg5: memref<16x128xf32, #tpu.memory_space<vmem>>) attributes {dimension_semantics = [#tpu.dimension_semantics<parallel>, #tpu.dimension_semantics<parallel>], iteration_bounds = array<i64: 1, 1>, scalar_prefetch = 0 : i64, scratch_operands = 0 : i64, tpu.core_type = #tpu.core_type<tc>, window_params = [{transform_indices = @transform_0, window_bounds = array<i64: 16, 128>}, {transform_indices = @transform_1, window_bounds = array<i64: 128, 128>}, {transform_indices = @transform_2, window_bounds = array<i64: 1, 128>}, {transform_indices = @transform_3, window_bounds = array<i64: 16, 128>}]} {
    %c0 = arith.constant 0 : index
    %c0_0 = arith.constant 0 : index
    %0 = vector.load %arg2[%c0, %c0_0] : memref<16x128xbf16, #tpu.memory_space<vmem>>, vector<16x128xbf16>
    %c0_1 = arith.constant 0 : index
    %c0_2 = arith.constant 0 : index
    %1 = vector.load %arg3[%c0_1, %c0_2] : memref<128x128xbf16, #tpu.memory_space<vmem>>, vector<128x128xbf16>
    %cst = arith.constant dense<0.000000e+00> : vector<16x128xf32>
    %2 = tpu.matmul %0, %1, %cst {dimension_numbers = #tpu.dot_dimension_numbers<[1], [0], [0], [1], [0, 0, 1, 1], [], []>} : vector<16x128xbf16>, vector<128x128xbf16>, vector<16x128xf32> -> vector<16x128xf32>
    %c0_3 = arith.constant 0 : index
    %c0_4 = arith.constant 0 : index
    %3 = vector.load %arg4[%c0_3, %c0_4] : memref<1x128xf32, #tpu.memory_space<vmem>>, vector<1x128xf32>
    %4 = vector.broadcast %3 : vector<1x128xf32> to vector<16x128xf32>
    %5 = arith.addf %2, %4 : vector<16x128xf32>
    %c0_5 = arith.constant 0 : index
    %c0_6 = arith.constant 0 : index
    %6 = vector.load %arg5[%c0_5, %c0_6] : memref<16x128xf32, #tpu.memory_space<vmem>>, vector<16x128xf32>
    tpu.vector_store %arg5[%c0_5, %c0_6], %5 {strides = array<i32>} : memref<16x128xf32, #tpu.memory_space<vmem>>, vector<16x128xf32>,
    return
  }
  func.func @transform_0(%arg0: i32, %arg1: i32) -> (i32, i32) {
    %c0_i32 = arith.constant 0 : i32
    %c0_i32_0 = arith.constant 0 : i32
    return %arg0, %c0_i32 : i32, i32
  }
  func.func @transform_1(%arg0: i32, %arg1: i32) -> (i32, i32) {
    %c0_i32 = arith.constant 0 : i32
    %c0_i32_0 = arith.constant 0 : i32
    return %c0_i32, %arg1 : i32, i32
  }
  func.func @transform_2(%arg0: i32, %arg1: i32) -> (i32, i32) {
    %c0_i32 = arith.constant 0 : i32
    %c0_i32_0 = arith.constant 0 : i32
    return %c0_i32, %arg1 : i32, i32
  }
  func.func @transform_3(%arg0: i32, %arg1: i32) -> (i32, i32) {
    %c0_i32 = arith.constant 0 : i32
    return %arg0, %arg1 : i32, i32
  }
}

</mosaic_0001>

<bundles_post_ra>
// kernel: tpu_custom_call.1
= control target key start
LH: loop header
LB: loop body
LE: loop exit
PB: predicated region body
PF: predicated region fallthrough
CT: control target
= control target key end

     0   :  { %8 = vsyncpa [#allocation3], 0  ;;  %s348_s0 = inlined_call_operand.hbm [shape: bf16[16,128], index: 0, kind: input, shape index: {}]   ;;  %s349_s1 = inlined_call_operand.hbm [shape: bf16[128,128], index: 1, kind: input, shape index: {}]   ;;  %s350_s2 = inlined_call_operand.vmem [shape: f32[1,128], index: 2, kind: input, shape index: {}]   ;;  %s351_s3 = inlined_call_operand.hbm [shape: f32[16,128], index: 3, kind: output, shape index: {}]  }
   0x1   :  { %9 = vsyncpa [#allocation6], 0 }
   0x2   :  { %10 = vsyncpa [#allocation4], 0  ;;  %s307_s12 = smov [#allocation2]  }
   0x3   :  { %s16_s13 = sshll.u32 %s307_s12, 4  ;;  %s17_s13 = int_to_ptr.vmem [resolvable:$true] %s16_s13 }
   0x4   :  { %s249_s14 = scalar_lea.vmem %s17_s13, 128  ;;  %p254_p1 = scmp.lt.s32.totalorder %s17_s13, %s17_s13 }
   0x5   :  { %p250_p0 = scmp.ne.s32.totalorder %s17_s13, %s249_s14  ;;  %p255_p2 = scmp.lt.s32.totalorder %s249_s14, %s249_s14 }
   0x7   :  { %p256_p3 = por %p255_p2, %p254_p1 }
   0x9   :  { %p257_p4 = pnand %p256_p3, %p250_p0 }
   0xb   :  { %260 = shalt.err (!%p257_p4)
}
   0xc   :  { %s308_s15 = smov 64   ;;  %s309_s16 = smov 4  }
   0xd   :  { %22 = dma.hbm_to_vmem [thread:$0]  %s348_s0, 128, %s17_s13, [#allocation3], %s308_s15, %s308_s15, %s309_s16  }
   0xe   :  { %s310_s19 = smov [#allocation5]  }
   0xf   :  { %s28_s20 = sshll.u32 %s310_s19, 4  ;;  %s29_s20 = int_to_ptr.vmem [resolvable:$true] %s28_s20 }
  0x10   :  { %s269_s21 = scalar_lea.vmem %s29_s20, 1024  ;;  %p274_p6 = scmp.lt.s32.totalorder %s29_s20, %s29_s20 }
  0x11   :  { %p270_p5 = scmp.ne.s32.totalorder %s29_s20, %s269_s21  ;;  %p275_p7 = scmp.lt.s32.totalorder %s269_s21, %s269_s21 }
  0x13   :  { %p276_p8 = por %p275_p7, %p274_p6 }
  0x15   :  { %p277_p9 = pnand %p276_p8, %p270_p5 }
  0x17   :  { %280 = shalt.err (!%p277_p9)
}
  0x18   :  { %34 = dma.hbm_to_vmem [thread:$0]  %s349_s1, 1024, %s29_s20, [#allocation6], %s308_s15, %s308_s15, %s309_s16  }
  0x19   :  { %301 = dma.done.wait [#allocation3], 128  }
  0x1a   :  { %302 = vsyncadd [#allocation3], 4294967168 }
  0x1b   :  { %303 = dma.done.wait [#allocation6], 1024  }
  0x1c   :  { %304 = vsyncadd [#allocation6], 4294966272  ;;  %v311_v0 = vmov 0.0   ;;  %vm312_vm0 = vmmov 0   ;;  %v232_v1 = vld [vmem:[#allocation5 + $0x38] sm:$0xff]   ;;  %v233_v2 = vld [vmem:[#allocation5 + $0x30] sm:$0xff]  }
  0x1d   :  { %203 = vmatprep.subr.bf16.mxu0 %v311_v0  ;;  %219 = vmatprep.mubr.msk.bf16.mxu0 %vm312_vm0, %v311_v0  ;;  %v234_v3 = vld [vmem:[#allocation5 + $0x28] sm:$0xff]   ;;  %v235_v4 = vld [vmem:[#allocation5 + $0x20] sm:$0xff]   ;;  %v236_v5 = vld [vmem:[#allocation5 + $0x18] sm:$0xff]   ;;  %s313_s24 = smov [#allocation7]  }
  0x1e   :  { %204 = vmatpush3.bf16.msra.mxu0 %v232_v1  ;;  %v237_v6 = vld [vmem:[#allocation5 + $0x10] sm:$0xff]   ;;  %v238_v7 = vld [vmem:[#allocation5 + $0x8] sm:$0xff]   ;;  %v239_v8 = vld [vmem:[#allocation5] sm:$0xff]   ;;  %s171_s25 = sshll.u32 %s313_s24, 4  ;;  %s172_s25 = int_to_ptr.vmem [resolvable:$true] %s171_s25 }
  0x1f   :  { %205 = vmatprep.subr.bf16.mxu0 %v311_v0  ;;  %v240_v9 = vld [vmem:[#allocation2] sm:$0xff]   ;;  %s281_s26 = scalar_lea.vmem %s172_s25, 256  ;;  %p286_p11 = scmp.lt.s32.totalorder %s172_s25, %s172_s25 }
  0x20   :  { %v184_v10 = vld [vmem:[%s350_s2] ss:$0 sm:$0xff]  ;;  %p282_p10 = scmp.ne.s32.totalorder %s172_s25, %s281_s26  ;;  %p287_p12 = scmp.lt.s32.totalorder %s281_s26, %s281_s26 }
  0x22   :  { %206 = vmatpush3.bf16.msra.mxu0 %v233_v2  ;;  %p288_p13 = por %p287_p12, %p286_p11 }
  0x23   :  { %207 = vmatprep.subr.bf16.mxu0 %v311_v0 }
  0x24   :  { %p289_p0 = pnand %p288_p13, %p282_p10 }
  0x26   :  { %208 = vmatpush3.bf16.msra.mxu0 %v234_v3 }
  0x27   :  { %209 = vmatprep.subr.bf16.mxu0 %v311_v0 }
  0x2a   :  { %210 = vmatpush3.bf16.msra.mxu0 %v235_v4 }
  0x2b   :  { %211 = vmatprep.subr.bf16.mxu0 %v311_v0 }
  0x2e   :  { %212 = vmatpush3.bf16.msra.mxu0 %v236_v5 }
  0x2f   :  { %213 = vmatprep.subr.bf16.mxu0 %v311_v0 }
  0x32   :  { %214 = vmatpush3.bf16.msra.mxu0 %v237_v6 }
  0x33   :  { %215 = vmatprep.subr.bf16.mxu0 %v311_v0 }
  0x36   :  { %216 = vmatpush3.bf16.msra.mxu0 %v238_v7 }
  0x37   :  { %217 = vmatprep.subr.bf16.mxu0 %v311_v0 }
  0x3a   :  { %218 = vmatpush3.bf16.msra.mxu0 %v239_v8 }
  0x3d   :  { %220 = vmatmul.mubr.bf16.vlgmr.msra.gmra.mxu0 %v240_v9 }
  0xfd   :  { %v157_v11 = vpop.f32.mrf.mxu0 }
  0xfe   :  { %v158_v12 = vadd.f32 %v184_v10, %v157_v11 }
  0xff   :  { %v221_v13 = vpop.f32.mrf.mxu0 }
 0x100   :  { %164 = vst [vmem:[#allocation7] sm:$0xff] %v158_v12 }
 0x101   :  { %v160_v14 = vpop.f32.mrf.mxu0 }
 0x102   :  { %v161_v15 = vadd.f32 %v184_v10, %v160_v14 }
 0x103   :  { %v222_v16 = vpop.f32.mrf.mxu0 }
 0x104   :  { %165 = vst [vmem:[#allocation7 + $0x8] sm:$0xff] %v161_v15 }
 0x105   :  { %292 = shalt.err (!%p289_p0)
}
 0x106   :  { %s314_s27 = smov 128   ;;  %s315_s2 = smov 8  }
 0x107   :  { %177 = dma.vmem_to_hbm [thread:$0]  %s172_s25, 256, %s351_s3, [#allocation4], %s314_s27, %s314_s27, %s315_s2  }
 0x108   :  { %305 = dma.done.wait [#allocation4], 256  }
 0x109   :  { %306 = vsyncadd [#allocation4], 4294967040 }
 0x10a   :  { %181 = vsyncpa [#allocation3], 1 }
 0x10b   :  { %182 = vsyncpa [#allocation6], 1 }
 0x10c   :  { %183 = vsyncpa [#allocation4], 1 }

</bundles_post_ra>
